<compile_context>
chip_gen: v7x
topology: tpu7x:2x2x1
jax: 0.10.0
libtpu: 0.0.40
codegen_flags: <defaults>
</compile_context>

<pallas_src>
import functools

import jax
import jax.numpy as jnp
from jax.experimental import pallas as pl
from jax.experimental.pallas import tpu as pltpu


def _layernorm_kernel(x_ref, alpha_ref, bias_ref, o_ref, *, eps, features):
    # x_ref: (TM, F) row tile; alpha_ref/bias_ref: (1, F)
    x = x_ref[...].astype(jnp.float32)

    # One-pass statistics: the two cross-lane reductions are independent, so
    # they can issue back-to-back on the XLU (no reduce -> sub -> reduce chain).
    s = jnp.sum(x, axis=-1, keepdims=True)            # (TM, 1)
    sq = jnp.sum(x * x, axis=-1, keepdims=True)       # (TM, 1)
    mean = s * (1.0 / features)
    # torch.Tensor.std uses Bessel's correction (ddof = 1).
    var = (sq - features * mean * mean) * (1.0 / (features - 1))
    var = jnp.maximum(var, 0.0)                       # guard cancellation
    std = jnp.sqrt(var)

    # Narrow (TM, 1) reciprocal on the otherwise-idle EUP slot.
    inv = pl.reciprocal(std + eps, approx=True)       # (TM, 1)

    alpha = alpha_ref[...].astype(jnp.float32)        # (1, F)
    bias = bias_ref[...].astype(jnp.float32)          # (1, F)

    y = (x - mean) * inv * alpha + bias
    o_ref[...] = y.astype(o_ref.dtype)


def layer_norm_pallas(x, alpha, bias, eps=1e-6, block_rows=None):
    """LayerNormalization(features) over the last axis of x (any leading dims)."""
    orig_shape = x.shape
    F = orig_shape[-1]
    x2 = x.reshape(-1, F)
    N = x2.shape[0]

    # --- choose the row tile ---
    # Mem-bound kernel: biggest tile whose (2 in + 2 out) double buffers fit
    # comfortably under v7x's 64 MiB per-TC VMEM (also fine on v5e/v6e).
    if block_rows is None:
        tile_budget = 40 * 1024 * 1024
        bytes_per_row = 4 * F * max(x.dtype.itemsize, 4)   # 4 buffers, f32 math
        tm = tile_budget // max(bytes_per_row, 1)
        tm = int(max(8, min(tm, 2048)))
        tm = (tm // 8) * 8                                  # sublane multiple
    else:
        tm = block_rows

    # Never use a tile larger than the (8-padded) row count.
    n_rows8 = pl.cdiv(N, 8) * 8
    tm = min(tm, n_rows8)

    n_pad = pl.cdiv(N, tm) * tm
    if n_pad != N:
        # Zero rows are harmless (std=0 -> output=bias) and sliced away below.
        x2 = jnp.pad(x2, ((0, n_pad - N), (0, 0)))

    alpha2d = alpha.reshape(1, F)
    bias2d = bias.reshape(1, F)

    kernel = functools.partial(_layernorm_kernel, eps=eps, features=F)

    out = pl.pallas_call(
        kernel,
        out_shape=jax.ShapeDtypeStruct((n_pad, F), x.dtype),
        grid_spec=pltpu.PrefetchScalarGridSpec(
            num_scalar_prefetch=0,
            grid=(n_pad // tm,),
            in_specs=[
                pl.BlockSpec((tm, F), lambda i: (i, 0)),
                pl.BlockSpec((1, F), lambda i: (0, 0)),
                pl.BlockSpec((1, F), lambda i: (0, 0)),
            ],
            out_specs=pl.BlockSpec((tm, F), lambda i: (i, 0)),
        ),
        compiler_params=pltpu.CompilerParams(
            dimension_semantics=("parallel",),
            vmem_limit_bytes=48 * 1024 * 1024,
        ),
    )(x2, alpha2d, bias2d)

    if n_pad != N:
        out = out[:N]
    return out.reshape(orig_shape)


def decoder_forward(encoder_output, X, srs_mask, targ_mask, alpha, bias, eps=1e-6):
    # TODO(synk): `self.layers` is an injected, unspecified nn.ModuleList; with no
    # concrete layer class available it is treated as empty (identity) here.
    for _ in ():  # no decoder layers
        pass
    return layer_norm_pallas(X, alpha, bias, eps=eps)


if __name__ == "__main__":
    key = jax.random.PRNGKey(0)
    B, S, F = 2, 8, 32  # batch, target seq, features (hidden size)
    SRC = 8             # source seq length

    k1, k2 = jax.random.split(key)
    encoder_output = jax.random.normal(k1, (B, SRC, F), dtype=jnp.float32)
    X = jax.random.normal(k2, (B, S, F), dtype=jnp.float32)
    srs_mask = jnp.ones((B, 1, 1, SRC), dtype=jnp.float32)
    targ_mask = jnp.tril(jnp.ones((B, 1, S, S), dtype=jnp.float32))

    # LayerNormalization parameters: alpha = ones(features), bias = zeros(features)
    alpha = jnp.ones((F,), dtype=jnp.float32)
    bias = jnp.zeros((F,), dtype=jnp.float32)

    out = decoder_forward(encoder_output, X, srs_mask, targ_mask, alpha, bias)
    out = jax.block_until_ready(out)

    # Reference check (pure JAX, torch semantics: unbiased std, /(std+eps)).
    mean = jnp.mean(X, axis=-1, keepdims=True)
    std = jnp.sqrt(jnp.sum((X - mean) ** 2, axis=-1, keepdims=True) / (F - 1))
    ref = alpha * (X - mean) / (std + 1e-6) + bias
    # approx-reciprocal on the EUP contributes ~1e-4 relative error.
    err = float(jnp.max(jnp.abs(out - ref)))
    assert jnp.allclose(out, ref, atol=5e-3, rtol=5e-3), err

    print("KERNEL_OK")
</pallas_src>

<mosaic_0001>
module attributes {stable_mosaic.version = 11 : i64} {
  func.func @_layernorm_kernel(%arg0: i32, %arg1: memref<16x32xf32, #tpu.memory_space<vmem>>, %arg2: memref<1x32xf32, #tpu.memory_space<vmem>>, %arg3: memref<1x32xf32, #tpu.memory_space<vmem>>, %arg4: memref<16x32xf32, #tpu.memory_space<vmem>>) attributes {dimension_semantics = [#tpu.dimension_semantics<parallel>], iteration_bounds = array<i64: 1>, scalar_prefetch = 0 : i64, scratch_operands = 0 : i64, tpu.core_type = #tpu.core_type<tc>, window_params = [{transform_indices = @transform_0, window_bounds = array<i64: 16, 32>}, {pipeline_mode = #tpu.pipeline_mode<synchronous>, transform_indices = @transform_1, window_bounds = array<i64: 1, 32>}, {pipeline_mode = #tpu.pipeline_mode<synchronous>, transform_indices = @transform_2, window_bounds = array<i64: 1, 32>}, {transform_indices = @transform_3, window_bounds = array<i64: 16, 32>}]} {
    %c0 = arith.constant 0 : index
    %c0_0 = arith.constant 0 : index
    %0 = vector.load %arg1[%c0, %c0_0] : memref<16x32xf32, #tpu.memory_space<vmem>>, vector<16x32xf32>
    %cst = arith.constant dense<0.000000e+00> : vector<16xf32>
    %1 = vector.multi_reduction <add>, %0, %cst [1] : vector<16x32xf32> to vector<16xf32>
    %2 = vector.shape_cast %1 : vector<16xf32> to vector<16x1xf32>
    %3 = arith.mulf %0, %0 : vector<16x32xf32>
    %cst_1 = arith.constant dense<0.000000e+00> : vector<16xf32>
    %4 = vector.multi_reduction <add>, %3, %cst_1 [1] : vector<16x32xf32> to vector<16xf32>
    %5 = vector.shape_cast %4 : vector<16xf32> to vector<16x1xf32>
    %cst_2 = arith.constant 3.125000e-02 : f32
    %6 = vector.broadcast %cst_2 : f32 to vector<16x1xf32>
    %7 = arith.mulf %2, %6 : vector<16x1xf32>
    %cst_3 = arith.constant 3.200000e+01 : f32
    %8 = vector.broadcast %cst_3 : f32 to vector<16x1xf32>
    %9 = arith.mulf %8, %7 : vector<16x1xf32>
    %10 = arith.mulf %9, %7 : vector<16x1xf32>
    %11 = arith.subf %5, %10 : vector<16x1xf32>
    %cst_4 = arith.constant 0.0322580636 : f32
    %12 = vector.broadcast %cst_4 : f32 to vector<16x1xf32>
    %13 = arith.mulf %11, %12 : vector<16x1xf32>
    %cst_5 = arith.constant 0.000000e+00 : f32
    %14 = vector.broadcast %cst_5 : f32 to vector<16x1xf32>
    %15 = arith.maximumf %13, %14 : vector<16x1xf32>
    %16 = math.sqrt %15 : vector<16x1xf32>
    %cst_6 = arith.constant 9.99999997E-7 : f32
    %17 = vector.broadcast %cst_6 : f32 to vector<16x1xf32>
    %18 = arith.addf %16, %17 : vector<16x1xf32>
    %19 = tpu.reciprocal %18 {approx = true} : vector<16x1xf32> -> vector<16x1xf32>
    %c0_7 = arith.constant 0 : index
    %c0_8 = arith.constant 0 : index
    %20 = vector.load %arg2[%c0_7, %c0_8] : memref<1x32xf32, #tpu.memory_space<vmem>>, vector<1x32xf32>
    %c0_9 = arith.constant 0 : index
    %c0_10 = arith.constant 0 : index
    %21 = vector.load %arg3[%c0_9, %c0_10] : memref<1x32xf32, #tpu.memory_space<vmem>>, vector<1x32xf32>
    %22 = vector.broadcast %7 : vector<16x1xf32> to vector<16x32xf32>
    %23 = arith.subf %0, %22 : vector<16x32xf32>
    %24 = vector.broadcast %19 : vector<16x1xf32> to vector<16x32xf32>
    %25 = arith.mulf %23, %24 : vector<16x32xf32>
    %26 = vector.broadcast %20 : vector<1x32xf32> to vector<16x32xf32>
    %27 = arith.mulf %25, %26 : vector<16x32xf32>
    %28 = vector.broadcast %21 : vector<1x32xf32> to vector<16x32xf32>
    %29 = arith.addf %27, %28 : vector<16x32xf32>
    %c0_11 = arith.constant 0 : index
    %c0_12 = arith.constant 0 : index
    %30 = vector.load %arg4[%c0_11, %c0_12] : memref<16x32xf32, #tpu.memory_space<vmem>>, vector<16x32xf32>
    tpu.vector_store %arg4[%c0_11, %c0_12], %29 {strides = array<i32>} : memref<16x32xf32, #tpu.memory_space<vmem>>, vector<16x32xf32>,
    return
  }
  func.func @transform_0(%arg0: i32) -> (i32, i32) {
    %c0_i32 = arith.constant 0 : i32
    %c0_i32_0 = arith.constant 0 : i32
    return %arg0, %c0_i32 : i32, i32
  }
  func.func @transform_1(%arg0: i32) -> (i32, i32) {
    %c0_i32 = arith.constant 0 : i32
    %c0_i32_0 = arith.constant 0 : i32
    %c0_i32_1 = arith.constant 0 : i32
    return %c0_i32, %c0_i32_0 : i32, i32
  }
  func.func @transform_2(%arg0: i32) -> (i32, i32) {
    %c0_i32 = arith.constant 0 : i32
    %c0_i32_0 = arith.constant 0 : i32
    %c0_i32_1 = arith.constant 0 : i32
    return %c0_i32, %c0_i32_0 : i32, i32
  }
  func.func @transform_3(%arg0: i32) -> (i32, i32) {
    %c0_i32 = arith.constant 0 : i32
    %c0_i32_0 = arith.constant 0 : i32
    return %arg0, %c0_i32 : i32, i32
  }
}

</mosaic_0001>

<bundles_post_ra>
// kernel: tpu_custom_call.1
= control target key start
LH: loop header
LB: loop body
LE: loop exit
PB: predicated region body
PF: predicated region fallthrough
CT: control target
= control target key end

     0   :  { %8 = vsyncpa [#allocation3], 0  ;;  %s245_s0 = inlined_call_operand.hbm [shape: f32[16,32], index: 0, kind: input, shape index: {}]   ;;  %s246_s1 = inlined_call_operand.vmem [shape: f32[1,32], index: 1, kind: input, shape index: {}]   ;;  %s247_s2 = inlined_call_operand.vmem [shape: f32[1,32], index: 2, kind: input, shape index: {}]   ;;  %s248_s3 = inlined_call_operand.hbm [shape: f32[16,32], index: 3, kind: output, shape index: {}]  }
   0x1   :  { %9 = vsyncpa [#allocation4], 0  ;;  %s179_s12 = smov [#allocation2]   ;;  %s131_s16 = scalar_lea.hbm %s245_s0, 256 }
   0x2   :  { %s15_s13 = sshll.u32 %s179_s12, 4  ;;  %p132_p0 = scmp.ne.s32.totalorder %s245_s0, %s131_s16  ;;  %s16_s13 = int_to_ptr.vmem [resolvable:$true] %s15_s13 }
   0x3   :  { %p135_p1 = scmp.lt.u32.totalorder %s131_s16, %s245_s0 }
   0x5   :  { %p137_p2 = pnand %p135_p1, %p132_p0 }
   0x7   :  { %140 = shalt.err (!%p137_p2)
}
   0x8   :  { %s141_s21 = scalar_lea.vmem %s16_s13, 256  ;;  %p146_p4 = scmp.lt.s32.totalorder %s16_s13, %s16_s13 }
   0x9   :  { %p142_p3 = scmp.ne.s32.totalorder %s16_s13, %s141_s21  ;;  %p147_p5 = scmp.lt.s32.totalorder %s141_s21, %s141_s21 }
   0xb   :  { %p148_p6 = por %p147_p5, %p146_p4 }
   0xd   :  { %p149_p7 = pnand %p148_p6, %p142_p3 }
   0xf   :  { %152 = shalt.err (!%p149_p7)
}
  0x10   :  { %s180_s22 = smov 128   ;;  %s181_s23 = smov 8  }
  0x11   :  { %21 = dma.hbm_to_vmem [thread:$0]  %s245_s0, 256, %s16_s13, [#allocation3], %s180_s22, %s180_s22, %s181_s23  }
  0x12   :  { %175 = dma.done.wait [#allocation3], 256  }
  0x13   :  { %176 = vsyncadd [#allocation3], 4294967040  ;;  %vm31_vm0 = vcmask 261120   ;;  %v29_v0 = vld [vmem:[#allocation2] sm:$0xff]  ;;  %v30_v1 = vld [vmem:[#allocation2 + $0x8] sm:$0xff]  ;;  %s182_s29 = smov [#allocation5]  }
  0x14   :  { %v32_v2 = vsel %vm31_vm0, %v29_v0, 0.0  ;;  %v38_v3 = vmul.f32 %v29_v0, %v29_v0  ;;  %v39_v4 = vmul.f32 %v30_v1, %v30_v1  ;;  %v35_v5 = vsel %vm31_vm0, %v30_v1, 0.0  ;;  %v117_v38 = vld [vmem:[%s246_s1] ss:$0 sm:$0xff]  ;;  %s105_s30 = sshll.u32 %s182_s29, 4  ;;  %s106_s30 = int_to_ptr.vmem [resolvable:$true] %s105_s30 }
  0x15   :  { %33 = vadd.xlane.f32.xlu0 %v32_v2  ;;  %v118_v40 = vld [vmem:[%s247_s2] ss:$0 sm:$0xff]  ;;  %s153_s1 = scalar_lea.vmem %s106_s30, 256  ;;  %p158_p9 = scmp.lt.s32.totalorder %s106_s30, %s106_s30 }
  0x16   :  { %v40_v6 = vsel %vm31_vm0, %v38_v3, 0.0  ;;  %v43_v7 = vsel %vm31_vm0, %v39_v4, 0.0  ;;  %p154_p8 = scmp.ne.s32.totalorder %s106_s30, %s153_s1  ;;  %p159_p10 = scmp.lt.s32.totalorder %s153_s1, %s153_s1 }
  0x17   :  { %41 = vadd.xlane.f32.xlu1 %v40_v6 }
  0x18   :  { %p160_p11 = por %p159_p10, %p158_p9 }
  0x19   :  { %36 = vadd.xlane.f32.xlu0 %v35_v5 }
  0x1a   :  { %p161_p12 = pnand %p160_p11, %p154_p8 }
  0x1b   :  { %44 = vadd.xlane.f32.xlu1 %v43_v7 }
  0xa2   :  { %v34_v8 = vpop.xlane.xlu0 %33 }
  0xa3   :  { %v46_v9 = vmul.f32 0.03125, %v34_v8 }
  0xa4   :  { %v42_v10 = vpop.xlane.xlu1 %41 }
  0xa5   :  { %v48_v11 = vmul.f32 32.0, %v46_v9  ;;  %v78_v36 = vsub.f32 %v29_v0, %v46_v9 }
  0xa6   :  { %v37_v12 = vpop.xlane.xlu0 %36 }
  0xa7   :  { %v47_v13 = vmul.f32 0.03125, %v37_v12  ;;  %v50_v14 = vmul.f32 %v48_v11, %v46_v9 }
  0xa8   :  { %v45_v17 = vpop.xlane.xlu1 %44 }
  0xa9   :  { %v49_v15 = vmul.f32 32.0, %v47_v13  ;;  %v52_v16 = vsub.f32 %v42_v10, %v50_v14  ;;  %v79_v42 = vsub.f32 %v30_v1, %v47_v13 }
  0xab   :  { %v54_v18 = vmul.f32 0.032258064, %v52_v16  ;;  %v51_v19 = vmul.f32 %v49_v15, %v47_v13 }
  0xad   :  { %v56_v20 = vmax.f32 %v54_v18, 0.0  ;;  %v53_v21 = vsub.f32 %v45_v17, %v51_v19 }
  0xaf   :  { %123 = vrsqrt.f32 %v56_v20  ;;  %v55_v22 = vmul.f32 0.032258064, %v53_v21  ;;  %vm60_vm1 = vcmp.eq.f32.partialorder %v56_v20, inf  ;;  %v63_v26 = vand.u32 2147483648, %v56_v20 }
  0xb0   :  { %vm62_vm2 = vcmp.eq.f32.partialorder %v56_v20, 0.0 }
  0xb1   :  { %v57_v23 = vmax.f32 %v55_v22, 0.0 }
  0xb3   :  { %125 = vrsqrt.f32 %v57_v23  ;;  %vm67_vm3 = vcmp.eq.f32.partialorder %v57_v23, inf  ;;  %v70_v32 = vand.u32 2147483648, %v57_v23  ;;  %vm69_vm4 = vcmp.eq.f32.partialorder %v57_v23, 0.0 }
  0xb9   :  { %v124_v24 = vpop.eup %123 }
  0xba   :  { %v59_v25 = vmul.f32 %v124_v24, %v56_v20 }
  0xbc   :  { %v61_v27 = vsel %vm60_vm1, %v56_v20, %v59_v25 }
  0xbd   :  { %v64_v28 = vsel %vm62_vm2, %v63_v26, %v61_v27  ;;  %v126_v29 = vpop.eup %125 }
  0xbe   :  { %v72_v30 = vadd.f32 1e-06, %v64_v28  ;;  %v66_v31 = vmul.f32 %v126_v29, %v57_v23 }
  0xc0   :  { %127 = vrcp.f32 %v72_v30  ;;  %v68_v33 = vsel %vm67_vm3, %v57_v23, %v66_v31 }
  0xc1   :  { %v71_v34 = vsel %vm69_vm4, %v70_v32, %v68_v33 }
  0xc2   :  { %v73_v35 = vadd.f32 1e-06, %v71_v34 }
  0xc4   :  { %129 = vrcp.f32 %v73_v35 }
  0xca   :  { %v128_v37 = vpop.eup %127 }
  0xcb   :  { %v80_v39 = vmul.f32 %v128_v37, %v78_v36 }
  0xcd   :  { %v88_v41 = vmul.f32 %v117_v38, %v80_v39 }
  0xce   :  { %v130_v43 = vpop.eup %129 }
  0xcf   :  { %v96_v44 = vadd.f32 %v118_v40, %v88_v41  ;;  %v81_v45 = vmul.f32 %v130_v43, %v79_v42 }
  0xd1   :  { %98 = vst.msk [vmem:[#allocation5] sm:$0xff] %vm31_vm0, %v96_v44  ;;  %v89_v46 = vmul.f32 %v117_v38, %v81_v45 }
  0xd3   :  { %v97_v47 = vadd.f32 %v118_v40, %v89_v46 }
  0xd5   :  { %99 = vst.msk [vmem:[#allocation5 + $0x8] sm:$0xff] %vm31_vm0, %v97_v47 }
  0xd6   :  { %164 = shalt.err (!%p161_p12)
}
  0xd7   :  { %s165_s5 = scalar_lea.hbm %s248_s3, 256 }
  0xd8   :  { %p166_p13 = scmp.ne.s32.totalorder %s248_s3, %s165_s5  ;;  %p169_p0 = scmp.lt.u32.totalorder %s165_s5, %s248_s3 }
  0xda   :  { %p171_p1 = pnand %p169_p0, %p166_p13 }
  0xdc   :  { %174 = shalt.err (!%p171_p1)
}
  0xdd   :  { %111 = dma.vmem_to_hbm [thread:$0]  %s106_s30, 256, %s248_s3, [#allocation4], %s180_s22, %s180_s22, %s181_s23  }
  0xde   :  { %177 = dma.done.wait [#allocation4], 256  }
  0xdf   :  { %178 = vsyncadd [#allocation4], 4294967040 }
  0xe0   :  { %115 = vsyncpa [#allocation3], 1 }
  0xe1   :  { %116 = vsyncpa [#allocation4], 1 }

</bundles_post_ra>
